<compile_context>
chip_gen: v7x
topology: tpu7x:2x2x1
jax: 0.10.0
libtpu: 0.0.40
codegen_flags: <defaults>
</compile_context>

<pallas_src>
import functools
import math

import jax
import jax.numpy as jnp
from jax.experimental import pallas as pl
from jax.experimental.pallas import tpu as pltpu

_LANES = 128
_SUBLANES = 8
_MAX_ROWS_PER_CHUNK = 512  # 512*128 f32 = 256 KiB per input per chunk


def _ncc_kernel(x_ref, y_ref, out_ref,
                sx_ref, sy_ref, sxx_ref, syy_ref, sxy_ref,
                *, n_true, eps):
    """grid = (batch, num_chunks).

    x_ref / y_ref : (1, TR, 128) chunk of the flattened, zero-padded input.
    out_ref       : (1, 8, 128) per-batch output tile (scalar broadcast).
    s*_ref        : (8, 128) f32 VMEM accumulators for the five raw moments.
    """
    k = pl.program_id(1)
    last_k = pl.num_programs(1) - 1

    @pl.when(k == 0)
    def _():
        sx_ref[...] = jnp.zeros_like(sx_ref)
        sy_ref[...] = jnp.zeros_like(sy_ref)
        sxx_ref[...] = jnp.zeros_like(sxx_ref)
        syy_ref[...] = jnp.zeros_like(syy_ref)
        sxy_ref[...] = jnp.zeros_like(sxy_ref)

    x = x_ref[0].astype(jnp.float32)           # (TR, 128)
    y = y_ref[0].astype(jnp.float32)
    tr = x.shape[0]
    g = tr // _SUBLANES
    xr = x.reshape(g, _SUBLANES, _LANES)       # sublane regrouping only (free)
    yr = y.reshape(g, _SUBLANES, _LANES)

    # Lane/sublane-aligned partial sums: pure VPU adds, no cross-lane reduce,
    # no SMEM read-modify-write on the hot path.
    sx_ref[...] += jnp.sum(xr, axis=0)
    sy_ref[...] += jnp.sum(yr, axis=0)
    sxx_ref[...] += jnp.sum(xr * xr, axis=0)
    syy_ref[...] += jnp.sum(yr * yr, axis=0)
    sxy_ref[...] += jnp.sum(xr * yr, axis=0)

    @pl.when(k == last_k)
    def _():
        inv_n = jnp.float32(1.0 / n_true)
        sx = jnp.sum(sx_ref[...])
        sy = jnp.sum(sy_ref[...])
        sxx = jnp.sum(sxx_ref[...])
        syy = jnp.sum(syy_ref[...])
        sxy = jnp.sum(sxy_ref[...])
        mean_x = sx * inv_n
        mean_y = sy * inv_n
        # Centered sums via raw-moment expansion; zero padding contributes 0
        # to every raw moment, so the true element count n is used throughout.
        dev_xy = sxy - sx * mean_y
        dev_xx = jnp.maximum(sxx - sx * mean_x, 0.0)
        dev_yy = jnp.maximum(syy - sy * mean_y, 0.0)
        ncc_b = (dev_xy + jnp.float32(eps)) / (
            jnp.sqrt(dev_xx * dev_yy) + jnp.float32(eps))
        out_ref[...] = jnp.full(out_ref.shape, ncc_b, dtype=out_ref.dtype)


def normalized_cross_correlation(x, y, *, eps=1e-8, reduction='mean'):
    """Pallas equivalent of NormalizedCrossCorrelation(eps, False, reduction)(x, y)."""
    assert x.shape == y.shape, (x.shape, y.shape)
    b = x.shape[0]
    n = int(math.prod(x.shape[1:]))

    # Flatten per batch; pad to a whole number of lane-dense (TR, 128) chunks.
    rows = (n + _LANES - 1) // _LANES
    rows = ((rows + _SUBLANES - 1) // _SUBLANES) * _SUBLANES
    if rows <= _MAX_ROWS_PER_CHUNK:
        tr = rows
        num_chunks = 1
    else:
        tr = _MAX_ROWS_PER_CHUNK
        num_chunks = (rows + tr - 1) // tr
        rows = num_chunks * tr
    padded = rows * _LANES

    xf = x.reshape(b, n)
    yf = y.reshape(b, n)
    if padded != n:
        # Zero padding is exact: it adds nothing to any of the raw moments.
        xf = jnp.pad(xf, ((0, 0), (0, padded - n)))
        yf = jnp.pad(yf, ((0, 0), (0, padded - n)))
    x3 = xf.reshape(b, rows, _LANES)
    y3 = yf.reshape(b, rows, _LANES)

    kern = functools.partial(_ncc_kernel, n_true=float(n), eps=float(eps))

    # Explicit scoped VMEM sized well above the tiny double-buffered chunks,
    # but safely below physical VMEM on every generation (v5e/v6e/v7x).
    itemsize = jnp.dtype(x.dtype).itemsize
    block_bytes = tr * _LANES * itemsize
    vmem_limit = int(min(96 * 1024 * 1024,
                         max(32 * 1024 * 1024, 8 * block_bytes)))

    out = pl.pallas_call(
        kern,
        out_shape=jax.ShapeDtypeStruct((b, _SUBLANES, _LANES), jnp.float32),
        grid=(b, num_chunks),
        in_specs=[
            pl.BlockSpec((1, tr, _LANES), lambda i, k: (i, k, 0)),
            pl.BlockSpec((1, tr, _LANES), lambda i, k: (i, k, 0)),
        ],
        out_specs=pl.BlockSpec((1, _SUBLANES, _LANES), lambda i, k: (i, 0, 0)),
        scratch_shapes=[pltpu.VMEM((_SUBLANES, _LANES), jnp.float32)] * 5,
        compiler_params=pltpu.CompilerParams(
            dimension_semantics=("parallel", "arbitrary"),
            vmem_limit_bytes=vmem_limit),
    )(x3, y3)

    ncc_per_batch = out[:, 0, 0]  # per-batch sum_i ncc[b, i]
    if reduction == 'mean':
        return jnp.mean(ncc_per_batch)
    elif reduction == 'sum':
        return jnp.sum(ncc_per_batch)
    raise KeyError('unsupported reduction type: %s' % reduction)
    # TODO(synk): return_map=True (per-element ncc map) is not emitted by this
    # kernel; only the reduced scalar path (the module's default) is implemented.


def _reference_ncc(x, y, eps=1e-8, reduction='mean'):
    """Pure-JAX mirror of the PyTorch normalized_cross_correlation forward."""
    b = x.shape[0]
    xf = x.reshape(b, -1).astype(jnp.float32)
    yf = y.reshape(b, -1).astype(jnp.float32)
    xd = xf - jnp.mean(xf, axis=1, keepdims=True)
    yd = yf - jnp.mean(yf, axis=1, keepdims=True)
    dev_xy = xd * yd
    dev_xx_sum = jnp.sum(xd * xd, axis=1, keepdims=True)
    dev_yy_sum = jnp.sum(yd * yd, axis=1, keepdims=True)
    ncc = (dev_xy + eps / dev_xy.shape[1]) / (
        jnp.sqrt(dev_xx_sum * dev_yy_sum) + eps)
    if reduction == 'mean':
        return jnp.mean(jnp.sum(ncc, axis=1))
    return jnp.sum(ncc)


if __name__ == "__main__":
    key = jax.random.PRNGKey(0)
    k1, k2 = jax.random.split(key)
    B, C, H, W = 2, 4, 16, 16
    x = jax.random.normal(k1, (B, C, H, W), dtype=jnp.float32)
    y = jax.random.normal(k2, (B, C, H, W), dtype=jnp.float32)

    loss = normalized_cross_correlation(x, y)
    loss = jax.block_until_ready(loss)

    ref = jax.block_until_ready(_reference_ncc(x, y))
    assert jnp.isfinite(loss), "kernel produced non-finite loss"
    assert jnp.allclose(loss, ref, rtol=1e-3, atol=1e-5), (loss, ref)

    print("KERNEL_OK")
</pallas_src>

<mosaic_0001>
module attributes {stable_mosaic.version = 11 : i64} {
  func.func @_ncc_kernel(%arg0: i32, %arg1: i32, %arg2: memref<1x8x128xf32, #tpu.memory_space<vmem>>, %arg3: memref<1x8x128xf32, #tpu.memory_space<vmem>>, %arg4: memref<1x8x128xf32, #tpu.memory_space<vmem>>, %arg5: memref<8x128xf32, #tpu.memory_space<vmem>>, %arg6: memref<8x128xf32, #tpu.memory_space<vmem>>, %arg7: memref<8x128xf32, #tpu.memory_space<vmem>>, %arg8: memref<8x128xf32, #tpu.memory_space<vmem>>, %arg9: memref<8x128xf32, #tpu.memory_space<vmem>>) attributes {dimension_semantics = [#tpu.dimension_semantics<parallel>, #tpu.dimension_semantics<arbitrary>], iteration_bounds = array<i64: 2, 1>, scalar_prefetch = 0 : i64, scratch_operands = 5 : i64, tpu.core_type = #tpu.core_type<tc>, window_params = [{transform_indices = @transform_0, window_bounds = array<i64: 1, 8, 128>}, {transform_indices = @transform_1, window_bounds = array<i64: 1, 8, 128>}, {transform_indices = @transform_2, window_bounds = array<i64: 1, 8, 128>}]} {
    %c0_i32 = arith.constant 0 : i32
    %0 = arith.cmpi eq, %arg1, %c0_i32 : i32
    %1 = arith.extui %0 : i1 to i32
    %c0_i32_0 = arith.constant 0 : i32
    %2 = arith.cmpi ne, %1, %c0_i32_0 : i32
    scf.if %2 {
      %cst_32 = arith.constant 0.000000e+00 : f32
      %35 = vector.broadcast %cst_32 : f32 to vector<8x128xf32>
      %c0_33 = arith.constant 0 : index
      %c0_34 = arith.constant 0 : index
      %36 = vector.load %arg5[%c0_33, %c0_34] : memref<8x128xf32, #tpu.memory_space<vmem>>, vector<8x128xf32>
      tpu.vector_store %arg5[%c0_33, %c0_34], %35 {strides = array<i32>} : memref<8x128xf32, #tpu.memory_space<vmem>>, vector<8x128xf32>,
      %cst_35 = arith.constant 0.000000e+00 : f32
      %37 = vector.broadcast %cst_35 : f32 to vector<8x128xf32>
      %c0_36 = arith.constant 0 : index
      %c0_37 = arith.constant 0 : index
      %38 = vector.load %arg6[%c0_36, %c0_37] : memref<8x128xf32, #tpu.memory_space<vmem>>, vector<8x128xf32>
      tpu.vector_store %arg6[%c0_36, %c0_37], %37 {strides = array<i32>} : memref<8x128xf32, #tpu.memory_space<vmem>>, vector<8x128xf32>,
      %cst_38 = arith.constant 0.000000e+00 : f32
      %39 = vector.broadcast %cst_38 : f32 to vector<8x128xf32>
      %c0_39 = arith.constant 0 : index
      %c0_40 = arith.constant 0 : index
      %40 = vector.load %arg7[%c0_39, %c0_40] : memref<8x128xf32, #tpu.memory_space<vmem>>, vector<8x128xf32>
      tpu.vector_store %arg7[%c0_39, %c0_40], %39 {strides = array<i32>} : memref<8x128xf32, #tpu.memory_space<vmem>>, vector<8x128xf32>,
      %cst_41 = arith.constant 0.000000e+00 : f32
      %41 = vector.broadcast %cst_41 : f32 to vector<8x128xf32>
      %c0_42 = arith.constant 0 : index
      %c0_43 = arith.constant 0 : index
      %42 = vector.load %arg8[%c0_42, %c0_43] : memref<8x128xf32, #tpu.memory_space<vmem>>, vector<8x128xf32>
      tpu.vector_store %arg8[%c0_42, %c0_43], %41 {strides = array<i32>} : memref<8x128xf32, #tpu.memory_space<vmem>>, vector<8x128xf32>,
      %cst_44 = arith.constant 0.000000e+00 : f32
      %43 = vector.broadcast %cst_44 : f32 to vector<8x128xf32>
      %c0_45 = arith.constant 0 : index
      %c0_46 = arith.constant 0 : index
      %44 = vector.load %arg9[%c0_45, %c0_46] : memref<8x128xf32, #tpu.memory_space<vmem>>, vector<8x128xf32>
      tpu.vector_store %arg9[%c0_45, %c0_46], %43 {strides = array<i32>} : memref<8x128xf32, #tpu.memory_space<vmem>>, vector<8x128xf32>,
    } else {
    }
    %c0 = arith.constant 0 : index
    %c0_1 = arith.constant 0 : index
    %c0_2 = arith.constant 0 : index
    %3 = vector.load %arg2[%c0, %c0_1, %c0_2] : memref<1x8x128xf32, #tpu.memory_space<vmem>>, vector<1x8x128xf32>
    %4 = vector.shape_cast %3 : vector<1x8x128xf32> to vector<8x128xf32>
    %c0_3 = arith.constant 0 : index
    %c0_4 = arith.constant 0 : index
    %c0_5 = arith.constant 0 : index
    %5 = vector.load %arg3[%c0_3, %c0_4, %c0_5] : memref<1x8x128xf32, #tpu.memory_space<vmem>>, vector<1x8x128xf32>
    %6 = vector.shape_cast %5 : vector<1x8x128xf32> to vector<8x128xf32>
    %7 = vector.shape_cast %4 : vector<8x128xf32> to vector<1x8x128xf32>
    %8 = vector.shape_cast %6 : vector<8x128xf32> to vector<1x8x128xf32>
    %c0_6 = arith.constant 0 : index
    %c0_7 = arith.constant 0 : index
    %9 = vector.load %arg5[%c0_6, %c0_7] : memref<8x128xf32, #tpu.memory_space<vmem>>, vector<8x128xf32>
    %cst = arith.constant dense<0.000000e+00> : vector<8x128xf32>
    %10 = vector.multi_reduction <add>, %7, %cst [0] : vector<1x8x128xf32> to vector<8x128xf32>
    %11 = arith.addf %9, %10 : vector<8x128xf32>
    %c0_8 = arith.constant 0 : index
    %c0_9 = arith.constant 0 : index
    %12 = vector.load %arg5[%c0_8, %c0_9] : memref<8x128xf32, #tpu.memory_space<vmem>>, vector<8x128xf32>
    tpu.vector_store %arg5[%c0_8, %c0_9], %11 {strides = array<i32>} : memref<8x128xf32, #tpu.memory_space<vmem>>, vector<8x128xf32>,
    %c0_10 = arith.constant 0 : index
    %c0_11 = arith.constant 0 : index
    %13 = vector.load %arg6[%c0_10, %c0_11] : memref<8x128xf32, #tpu.memory_space<vmem>>, vector<8x128xf32>
    %cst_12 = arith.constant dense<0.000000e+00> : vector<8x128xf32>
    %14 = vector.multi_reduction <add>, %8, %cst_12 [0] : vector<1x8x128xf32> to vector<8x128xf32>
    %15 = arith.addf %13, %14 : vector<8x128xf32>
    %c0_13 = arith.constant 0 : index
    %c0_14 = arith.constant 0 : index
    %16 = vector.load %arg6[%c0_13, %c0_14] : memref<8x128xf32, #tpu.memory_space<vmem>>, vector<8x128xf32>
    tpu.vector_store %arg6[%c0_13, %c0_14], %15 {strides = array<i32>} : memref<8x128xf32, #tpu.memory_space<vmem>>, vector<8x128xf32>,
    %c0_15 = arith.constant 0 : index
    %c0_16 = arith.constant 0 : index
    %17 = vector.load %arg7[%c0_15, %c0_16] : memref<8x128xf32, #tpu.memory_space<vmem>>, vector<8x128xf32>
    %18 = arith.mulf %7, %7 : vector<1x8x128xf32>
    %cst_17 = arith.constant dense<0.000000e+00> : vector<8x128xf32>
    %19 = vector.multi_reduction <add>, %18, %cst_17 [0] : vector<1x8x128xf32> to vector<8x128xf32>
    %20 = arith.addf %17, %19 : vector<8x128xf32>
    %c0_18 = arith.constant 0 : index
    %c0_19 = arith.constant 0 : index
    %21 = vector.load %arg7[%c0_18, %c0_19] : memref<8x128xf32, #tpu.memory_space<vmem>>, vector<8x128xf32>
    tpu.vector_store %arg7[%c0_18, %c0_19], %20 {strides = array<i32>} : memref<8x128xf32, #tpu.memory_space<vmem>>, vector<8x128xf32>,
    %c0_20 = arith.constant 0 : index
    %c0_21 = arith.constant 0 : index
    %22 = vector.load %arg8[%c0_20, %c0_21] : memref<8x128xf32, #tpu.memory_space<vmem>>, vector<8x128xf32>
    %23 = arith.mulf %8, %8 : vector<1x8x128xf32>
    %cst_22 = arith.constant dense<0.000000e+00> : vector<8x128xf32>
    %24 = vector.multi_reduction <add>, %23, %cst_22 [0] : vector<1x8x128xf32> to vector<8x128xf32>
    %25 = arith.addf %22, %24 : vector<8x128xf32>
    %c0_23 = arith.constant 0 : index
    %c0_24 = arith.constant 0 : index
    %26 = vector.load %arg8[%c0_23, %c0_24] : memref<8x128xf32, #tpu.memory_space<vmem>>, vector<8x128xf32>
    tpu.vector_store %arg8[%c0_23, %c0_24], %25 {strides = array<i32>} : memref<8x128xf32, #tpu.memory_space<vmem>>, vector<8x128xf32>,
    %c0_25 = arith.constant 0 : index
    %c0_26 = arith.constant 0 : index
    %27 = vector.load %arg9[%c0_25, %c0_26] : memref<8x128xf32, #tpu.memory_space<vmem>>, vector<8x128xf32>
    %28 = arith.mulf %7, %8 : vector<1x8x128xf32>
    %cst_27 = arith.constant dense<0.000000e+00> : vector<8x128xf32>
    %29 = vector.multi_reduction <add>, %28, %cst_27 [0] : vector<1x8x128xf32> to vector<8x128xf32>
    %30 = arith.addf %27, %29 : vector<8x128xf32>
    %c0_28 = arith.constant 0 : index
    %c0_29 = arith.constant 0 : index
    %31 = vector.load %arg9[%c0_28, %c0_29] : memref<8x128xf32, #tpu.memory_space<vmem>>, vector<8x128xf32>
    tpu.vector_store %arg9[%c0_28, %c0_29], %30 {strides = array<i32>} : memref<8x128xf32, #tpu.memory_space<vmem>>, vector<8x128xf32>,
    %c0_i32_30 = arith.constant 0 : i32
    %32 = arith.cmpi eq, %arg1, %c0_i32_30 : i32
    %33 = arith.extui %32 : i1 to i32
    %c0_i32_31 = arith.constant 0 : i32
    %34 = arith.cmpi ne, %33, %c0_i32_31 : i32
    scf.if %34 {
      %c0_32 = arith.constant 0 : index
      %c0_33 = arith.constant 0 : index
      %35 = vector.load %arg5[%c0_32, %c0_33] : memref<8x128xf32, #tpu.memory_space<vmem>>, vector<8x128xf32>
      %36 = vector.shape_cast %35 : vector<8x128xf32> to vector<1x8x128xf32>
      %cst_34 = arith.constant dense<0.000000e+00> : vector<1xf32>
      %37 = vector.multi_reduction <add>, %36, %cst_34 [1, 2] : vector<1x8x128xf32> to vector<1xf32>
      %38 = vector.shape_cast %37 : vector<1xf32> to vector<1x1x1xf32>
      %39 = vector.extract %38[0, 0, 0] : f32 from vector<1x1x1xf32>
      %c0_35 = arith.constant 0 : index
      %c0_36 = arith.constant 0 : index
      %40 = vector.load %arg6[%c0_35, %c0_36] : memref<8x128xf32, #tpu.memory_space<vmem>>, vector<8x128xf32>
      %41 = vector.shape_cast %40 : vector<8x128xf32> to vector<1x8x128xf32>
      %cst_37 = arith.constant dense<0.000000e+00> : vector<1xf32>
      %42 = vector.multi_reduction <add>, %41, %cst_37 [1, 2] : vector<1x8x128xf32> to vector<1xf32>
      %43 = vector.shape_cast %42 : vector<1xf32> to vector<1x1x1xf32>
      %44 = vector.extract %43[0, 0, 0] : f32 from vector<1x1x1xf32>
      %c0_38 = arith.constant 0 : index
      %c0_39 = arith.constant 0 : index
      %45 = vector.load %arg7[%c0_38, %c0_39] : memref<8x128xf32, #tpu.memory_space<vmem>>, vector<8x128xf32>
      %46 = vector.shape_cast %45 : vector<8x128xf32> to vector<1x8x128xf32>
      %cst_40 = arith.constant dense<0.000000e+00> : vector<1xf32>
      %47 = vector.multi_reduction <add>, %46, %cst_40 [1, 2] : vector<1x8x128xf32> to vector<1xf32>
      %48 = vector.shape_cast %47 : vector<1xf32> to vector<1x1x1xf32>
      %49 = vector.extract %48[0, 0, 0] : f32 from vector<1x1x1xf32>
      %c0_41 = arith.constant 0 : index
      %c0_42 = arith.constant 0 : index
      %50 = vector.load %arg8[%c0_41, %c0_42] : memref<8x128xf32, #tpu.memory_space<vmem>>, vector<8x128xf32>
      %51 = vector.shape_cast %50 : vector<8x128xf32> to vector<1x8x128xf32>
      %cst_43 = arith.constant dense<0.000000e+00> : vector<1xf32>
      %52 = vector.multi_reduction <add>, %51, %cst_43 [1, 2] : vector<1x8x128xf32> to vector<1xf32>
      %53 = vector.shape_cast %52 : vector<1xf32> to vector<1x1x1xf32>
      %54 = vector.extract %53[0, 0, 0] : f32 from vector<1x1x1xf32>
      %c0_44 = arith.constant 0 : index
      %c0_45 = arith.constant 0 : index
      %55 = vector.load %arg9[%c0_44, %c0_45] : memref<8x128xf32, #tpu.memory_space<vmem>>, vector<8x128xf32>
      %56 = vector.shape_cast %55 : vector<8x128xf32> to vector<1x8x128xf32>
      %cst_46 = arith.constant dense<0.000000e+00> : vector<1xf32>
      %57 = vector.multi_reduction <add>, %56, %cst_46 [1, 2] : vector<1x8x128xf32> to vector<1xf32>
      %58 = vector.shape_cast %57 : vector<1xf32> to vector<1x1x1xf32>
      %59 = vector.extract %58[0, 0, 0] : f32 from vector<1x1x1xf32>
      %cst_47 = arith.constant 9.765625E-4 : f32
      %60 = arith.mulf %39, %cst_47 : f32
      %cst_48 = arith.constant 9.765625E-4 : f32
      %61 = arith.mulf %44, %cst_48 : f32
      %62 = arith.mulf %39, %61 : f32
      %63 = arith.subf %59, %62 : f32
      %64 = arith.mulf %39, %60 : f32
      %65 = arith.subf %49, %64 : f32
      %cst_49 = arith.constant 0.000000e+00 : f32
      %66 = arith.maximumf %65, %cst_49 : f32
      %67 = arith.mulf %44, %61 : f32
      %68 = arith.subf %54, %67 : f32
      %cst_50 = arith.constant 0.000000e+00 : f32
      %69 = arith.maximumf %68, %cst_50 : f32
      %cst_51 = arith.constant 9.99999993E-9 : f32
      %70 = arith.addf %63, %cst_51 : f32
      %71 = arith.mulf %66, %69 : f32
      %72 = math.sqrt %71 : f32
      %cst_52 = arith.constant 9.99999993E-9 : f32
      %73 = arith.addf %72, %cst_52 : f32
      %74 = arith.divf %70, %73 : f32
      %75 = vector.broadcast %74 : f32 to vector<1x8x128xf32>
      %c0_53 = arith.constant 0 : index
      %c0_54 = arith.constant 0 : index
      %c0_55 = arith.constant 0 : index
      %76 = vector.load %arg4[%c0_53, %c0_54, %c0_55] : memref<1x8x128xf32, #tpu.memory_space<vmem>>, vector<1x8x128xf32>
      tpu.vector_store %arg4[%c0_53, %c0_54, %c0_55], %75 {strides = array<i32>} : memref<1x8x128xf32, #tpu.memory_space<vmem>>, vector<1x8x128xf32>,
    } else {
    }
    return
  }
  func.func @transform_0(%arg0: i32, %arg1: i32) -> (i32, i32, i32) {
    %c0_i32 = arith.constant 0 : i32
    %c0_i32_0 = arith.constant 0 : i32
    return %arg0, %arg1, %c0_i32 : i32, i32, i32
  }
  func.func @transform_1(%arg0: i32, %arg1: i32) -> (i32, i32, i32) {
    %c0_i32 = arith.constant 0 : i32
    %c0_i32_0 = arith.constant 0 : i32
    return %arg0, %arg1, %c0_i32 : i32, i32, i32
  }
  func.func @transform_2(%arg0: i32, %arg1: i32) -> (i32, i32, i32) {
    %c0_i32 = arith.constant 0 : i32
    %c0_i32_0 = arith.constant 0 : i32
    %c0_i32_1 = arith.constant 0 : i32
    return %arg0, %c0_i32, %c0_i32_0 : i32, i32, i32
  }
}

</mosaic_0001>

<bundles_post_ra>
// kernel: tpu_custom_call.1
= control target key start
LH: loop header
LB: loop body
LE: loop exit
PB: predicated region body
PF: predicated region fallthrough
CT: control target
= control target key end

     0   :  { %7 = vsyncpa [#allocation8], 0  ;;  %s940_s0 = inlined_call_operand.hbm [shape: f32[2,8,128], index: 0, kind: input, shape index: {}]   ;;  %s941_s1 = inlined_call_operand.hbm [shape: f32[2,8,128], index: 1, kind: input, shape index: {}]   ;;  %s942_s2 = inlined_call_operand.hbm [shape: f32[2,8,128], index: 2, kind: output, shape index: {}]  }
   0x1   :  { %9 = vsyncpa [#allocation8 + $0x1], 0 }
   0x2   :  { %10 = vsyncpa [#allocation11], 0 }
   0x3   :  { %12 = vsyncpa [#allocation11 + $0x1], 0 }
   0x4   :  { %13 = vsyncpa [#allocation9], 0 }
   0x5   :  { %15 = vsyncpa [#allocation9 + $0x1], 0  ;;  %s715_s9 = smov 0   ;;  %s717_s10 = smov 0  }
   0x6   :  { %s719_s11 = smov 0   ;;  %s721_s12 = smov 0  }
   0x7   :  { %s723_s13 = smov 0   ;;  %s725_s14 = smov 0  }
   0x8 LB: > { %s446_s15 = sadd.s32 4294967295, %s694_s14   ;;  %s447_s16 = sadd.s32 4294967294, %s694_s14   ;;  %s694_s14 = sphi %s725_s14, %s21_s14   ;;  %s690_s13 = sphi %s723_s13, %s962_s13   ;;  %s686_s12 = sphi %s721_s12, %s961_s12   ;;  %s682_s11 = sphi %s719_s11, %s960_s11   ;;  %s678_s10 = sphi %s717_s10, %s959_s10   ;;  %s674_s9 = sphi %s715_s9, %s958_s9  }
   0x9   : > { %s33_s17 = sadd.s32 1, %s690_s13  ;;  %s42_s18 = sadd.s32 1, %s682_s11 }
   0xa   : > { %p35_p0 = scmp.ge.s32.totalorder %s33_s17, 2  ;;  %p49_p1 = scmp.ne.s32.totalorder %s682_s11, %s678_s10 }
   0xb   : > { %p50_p2 = scmp.eq.s32.totalorder %s694_s14, 0  ;;  %p55_p3 = scmp.ne.s32.totalorder %s678_s10, %s674_s9 }
   0xc   : > { %s964_s17 = smov (%p35_p0, %s33_s17), 0  ;;  %p56_p5 = scmp.eq.s32.totalorder %s446_s15, 0 }
   0xd   : > { %p756_p4 = por %p50_p2, %p49_p1  ;;  %s37_s20 = ssub.s32 %s690_s13, %s964_s17 }
   0xe   : > { %p107_p6 = scmp.eq.s32.totalorder %s446_s15, 1  ;;  %p40_p7 = scmp.eq.s32.totalorder %s37_s20, 0 }
   0xf   : > { %p762_p8 = por %p56_p5, %p55_p3  ;;  %p113_p10 = scmp.eq.s32.totalorder %s447_s16, 1 }
  0x10   : > { %p766_p9 = por %p107_p6, %p49_p1  ;;  %p493_p13 = scmp.lt.s32.totalorder %s694_s14, 2 }
  0x11   : > { %s946_s21 = scalar_select %p762_p8, 1, 0 }
  0x12   : > { %s947_s22 = scalar_select %p766_p9, 1, 0 }
  0x13   : > { %s771_s23 = scalar_select %p40_p7, %s682_s11, %s42_s18  }
  0x14   : > { %p773_p11 = por %p113_p10, %p55_p3  ;;  %s780_s25 = sand.u32 1, %s682_s11  }
  0x15   : > { %s450_s26 = sshll.u32 %s780_s25, 3  ;;  %s451_s27 = sshll.u32 %s690_s13, 7 }
  0x16   : > { %s948_s24 = scalar_select %p773_p11, 1, 0 }
  0x17   : > { %s789_s30 = scalar_lea.hbm %s940_s0, %s451_s27  ;;  %s137_s3 = scalar_lea.vmem [#allocation7], %s450_s26 }
  0x18   : > { %s145_s4 = sshll.u32 %s137_s3, 4  ;;  %p797_p0 = pnand %p493_p13, %p756_p4  ;;  %s793_s4 = int_to_ptr.vmem [resolvable:$true] %s145_s4 }
  0x19   : > { %s134_s6 = scalar_lea.sflag [#allocation8], %s780_s25  ;;  %s548_s7 = scalar_lea.hbm %s789_s30, 128 }
  0x1a   : > { %p549_p3 = scmp.ne.s32.totalorder %s789_s30, %s548_s7  ;;  %p550_p5 = pneg %p797_p0 }
  0x1b   : > { %s553_s16 = scalar_lea.hbm %s940_s0, 256  ;;  %p554_p4 = scmp.lt.u32.totalorder %s789_s30, %s940_s0 }
  0x1c   : > { %p551_p6 = pnand %p550_p5, %p549_p3  ;;  %p555_p10 = scmp.lt.u32.totalorder %s553_s16, %s548_s7 }
  0x1d   : > { %p557_p12 = scmp.lt.u32.totalorder %s548_s7, %s789_s30 }
  0x1e   : > { %p552_p7 = pneg %p551_p6  ;;  %p556_p13 = por %p555_p10, %p554_p4 }
  0x20   : > { %p558_p1 = por %p557_p12, %p556_p13 }
  0x22   : > { %p559_p2 = pnand %p558_p1, %p552_p7 }
  0x24   : > { %562 = shalt.err (!%p559_p2)
}
  0x25   : > { %s563_s20 = scalar_lea.vmem %s793_s4, 128  ;;  %s696_s28 = smov [#allocation7]  }
  0x26   : > { %p564_p3 = scmp.ne.s32.totalorder %s793_s4, %s563_s20  ;;  %s568_s29 = sshll.u32 %s696_s28, 4  ;;  %s569_s29 = int_to_ptr.vmem [resolvable:$false] %s568_s29 }
  0x27   : > { %s570_s3 = scalar_lea.vmem %s569_s29, 256  ;;  %p571_p9 = scmp.lt.s32.totalorder %s793_s4, %s569_s29 }
  0x28   : > { %p566_p6 = pnand %p564_p3, %p550_p5  ;;  %p572_p4 = scmp.lt.s32.totalorder %s570_s3, %s563_s20 }
  0x2a   : > { %p567_p11 = pneg %p566_p6  ;;  %p573_p10 = por %p572_p4, %p571_p9 }
  0x2c   : > { %p574_p12 = pnand %p573_p10, %p567_p11 }
  0x2e   : > { %577 = shalt.err (!%p574_p12)
}
  0x2f   : > { %485 = dma.hbm_to_vmem [thread:$0]  (!%p797_p0), %s789_s30, 128, %s793_s4, %s134_s6  }
  0x30   : > { %p950_p1 = scmp.lt.s32.totalorder %s694_s14, 3  ;;  %p951_p2 = scmp.ge.s32.totalorder %s694_s14, 1 }
  0x31   : > { %s842_s16 = scalar_lea.hbm %s941_s1, %s451_s27  ;;  %s156_s18 = scalar_lea.vmem [#allocation10], %s450_s26 }
  0x32   : > { %p833_p7 = pnand %p951_p2, %p950_p1  ;;  %s164_s19 = sshll.u32 %s156_s18, 4  ;;  %s165_s19 = int_to_ptr.vmem [resolvable:$true] %s164_s19 }
  0x33   : > { %s153_s30 = scalar_lea.sflag [#allocation11], %s780_s25  ;;  %s578_s4 = scalar_lea.hbm %s842_s16, 128 }
  0x34   : > { %s952_s7 = scalar_select %p833_p7, 1, 0 }
  0x35   : > { %p579_p9 = scmp.ne.s32.totalorder %s842_s16, %s578_s4  ;;  %s583_s27 = scalar_lea.hbm %s941_s1, 256 }
  0x36   : > { %p584_p3 = scmp.lt.u32.totalorder %s842_s16, %s941_s1  ;;  %p585_p6 = scmp.lt.u32.totalorder %s583_s27, %s578_s4 }
  0x37   : > { %p581_p11 = pnand %p579_p9, %p550_p5  ;;  %p587_p10 = scmp.lt.u32.totalorder %s578_s4, %s842_s16 }
  0x38   : > { %p586_p4 = por %p585_p6, %p584_p3 }
  0x39   : > { %p582_p13 = pneg %p581_p11 }
  0x3a   : > { %p588_p12 = por %p587_p10, %p586_p4 }
  0x3c   : > { %p589_p1 = pnand %p588_p12, %p582_p13 }
  0x3e   : > { %592 = shalt.err (!%p589_p1)
}
  0x3f   : > { %s593_s25 = scalar_lea.vmem %s165_s19, 128  ;;  %s697_s26 = smov [#allocation10]  }
  0x40   : > { %p594_p2 = scmp.ne.s32.totalorder %s165_s19, %s593_s25  ;;  %s598_s3 = sshll.u32 %s697_s26, 4  ;;  %s599_s3 = int_to_ptr.vmem [resolvable:$false] %s598_s3 }
  0x41   : > { %s600_s8 = scalar_lea.vmem %s599_s3, 256  ;;  %p601_p8 = scmp.lt.s32.totalorder %s165_s19, %s599_s3 }
  0x42   : > { %p596_p9 = pnand %p594_p2, %p550_p5  ;;  %p602_p7 = scmp.lt.s32.totalorder %s600_s8, %s593_s25 }
  0x44   : > { %p597_p11 = pneg %p596_p9  ;;  %p603_p3 = por %p602_p7, %p601_p8 }
  0x46   : > { %p604_p6 = pnand %p603_p3, %p597_p11 }
  0x48   : > { %607 = shalt.err (!%p604_p6)
}
  0x49   : > { %488 = dma.hbm_to_vmem [thread:$0]  (!%p797_p0), %s842_s16, 128, %s165_s19, %s153_s30  }
  0x4a   : > { %p953_p13 = scmp.ne.s32.totalorder %s952_s7, 0 }
  0x4b   : > { %s869_s15 = sand.u32 (!%p953_p13), 1, %s678_s10   ;;  %p954_p8 = scmp.ne.s32.totalorder (!%p953_p13), %s946_s21, 0 }
  0x4c   : > { %173 = sbr.rel (%p953_p13) target bundleno = 451 (0x1c3), region = 28  ;;  %s872_s18 = sshll.u32 (!%p953_p13), %s869_s15, 3 }
  0x4d   : > { %s176_s4 = scalar_lea.sflag (!%p953_p13), [#allocation8], %s869_s15  ;;  %s179_s6 = scalar_lea.vmem (!%p953_p13), [#allocation7], %s872_s18 }
  0x53   : > { %661 = dma.done.wait (%p954_p8), %s176_s4, 128  }
  0x54   : > { %663 = vsyncadd (%p954_p8), %s176_s4, 4294967168  ;;  %s185_s5 = scalar_lea.sflag [#allocation11], %s869_s15  ;;  %s188_s7 = scalar_lea.vmem [#allocation10], %s872_s18 }
  0x55   : > { %665 = dma.done.wait (%p954_p8), %s185_s5, 128  }
  0x56   : > { %667 = vsyncadd (%p954_p8), %s185_s5, 4294967168  ;;  %v223_v0 = vld [vmem:[%s179_s6] sm:$0xff]  ;;  %v224_v1 = vld [vmem:[%s188_s7] sm:$0xff]  ;;  %s698_s8 = smov 0.0   ;;  %p955_p5 = scmp.ne.s32.totalorder %s947_s22, 0 }
  0x57   : > { %252 = vadd.xlane.f32.xlu0 %v223_v0  ;;  %v234_v2 = vmul.f32 %v223_v0, %v223_v0  ;;  %v239_v3 = vmul.f32 %v224_v1, %v224_v1  ;;  %v244_v4 = vmul.f32 %v224_v1, %v223_v0 }
  0x59   : > { %272 = vadd.xlane.f32.xlu1 %v234_v2 }
  0x5b   : > { %262 = vadd.xlane.f32.xlu0 %v224_v1 }
  0x5d   : > { %282 = vadd.xlane.f32.xlu1 %v239_v3 }
  0x5f   : > { %292 = vadd.xlane.f32.xlu0 %v244_v4 }
  0xe4   : > { %v253_v5 = vpop.xlane.xlu0 %252 }
  0xe5   : > { %v254_v6 = vrot.slane %v253_v5, 4 }
  0xe6   : > { %v273_v7 = vpop.xlane.xlu1 %272 }
  0xe7   : > { %v255_v8 = vadd.f32 %v254_v6, %v253_v5  ;;  %v274_v9 = vrot.slane %v273_v7, 4 }
  0xe8   : > { %v263_v10 = vpop.xlane.xlu0 %262 }
  0xe9   : > { %v256_v11 = vrot.slane %v255_v8, 2  ;;  %v275_v12 = vadd.f32 %v274_v9, %v273_v7  ;;  %v264_v13 = vrot.slane %v263_v10, 4 }
  0xea   : > { %v283_v14 = vpop.xlane.xlu1 %282 }
  0xeb   : > { %v276_v15 = vrot.slane %v275_v12, 2  ;;  %v265_v16 = vadd.f32 %v264_v13, %v263_v10  ;;  %v284_v17 = vrot.slane %v283_v14, 4  ;;  %v257_v18 = vadd.f32 %v256_v11, %v255_v8 }
  0xec   : > { %v293_v19 = vpop.xlane.xlu0 %292 }
  0xed   : > { %v266_v20 = vrot.slane %v265_v16, 2  ;;  %v285_v21 = vadd.f32 %v284_v17, %v283_v14  ;;  %v294_v22 = vrot.slane %v293_v19, 4  ;;  %v258_v23 = vrot.slane %v257_v18, 1 }
  0xee   : > { %v277_v24 = vadd.f32 %v276_v15, %v275_v12 }
  0xef   : > { %v286_v25 = vrot.slane %v285_v21, 2  ;;  %v295_v26 = vadd.f32 %v294_v22, %v293_v19  ;;  %v259_v27 = vadd.f32 %v258_v23, %v257_v18  ;;  %v267_v28 = vadd.f32 %v266_v20, %v265_v16 }
  0xf0   : > { %v278_v29 = vrot.slane %v277_v24, 1 }
  0xf1   : > { %v287_v30 = vadd.f32 %v286_v25, %v285_v21  ;;  %v296_v31 = vrot.slane %v295_v26, 2  ;;  %462 = vpush %v259_v27  ;;  %v268_v32 = vrot.slane %v267_v28, 1 }
  0xf2   : > { %v279_v36 = vadd.f32 %v278_v29, %v277_v24 }
  0xf3   : > { %v297_v33 = vadd.f32 %v296_v31, %v295_v26  ;;  %v269_v34 = vadd.f32 %v268_v32, %v267_v28  ;;  %v288_v35 = vrot.slane %v287_v30, 1 }
  0xf5   : > { %464 = vpush %v269_v34  ;;  %v289_v37 = vadd.f32 %v288_v35, %v287_v30  ;;  %v298_v38 = vrot.slane %v297_v33, 1 }
  0xf6   : > { %466 = vpush %v279_v36 }
  0xf7   : > { %468 = vpush %v289_v37  ;;  %v299_v39 = vadd.f32 %v298_v38, %v297_v33 }
  0xf9   : > { %470 = vpush %v299_v39 }
 0x122   : > { %s463_s21 = spop %462 }
 0x123   : > { %s301_s16 = smul.f32 0.0009765625, %s463_s21 }
 0x125   : > { %s305_s19 = smul.f32 %s463_s21, %s301_s16 }
 0x126   : > { %s465_s30 = spop %464 }
 0x127   : > { %s302_s20 = smul.f32 0.0009765625, %s465_s30  ;;  %s467_s27 = spop %466 }
 0x128   : > { %s306_s29 = ssub.f32 %s467_s27, %s305_s19  ;;  %s469_s25 = spop %468 }
 0x129   : > { %s308_s28 = smul.f32 %s465_s30, %s302_s20  ;;  %s213_s27 = scalar_lea.vmem [#allocation12], %s872_s18 }
 0x12a   : > { %s303_s3 = smul.f32 %s463_s21, %s302_s20  ;;  %s307_s4 = smax.f32 %s698_s8, %s306_s29 }
 0x12b   : > { %s309_s26 = ssub.f32 %s469_s25, %s308_s28  ;;  %s471_s7 = spop %470 }
 0x12c   : > { %s304_s21 = ssub.f32 %s471_s7, %s303_s3  ;;  %s459_s20 = sshll.u32 %s686_s12, 7 }
 0x12d   : > { %s310_s6 = smax.f32 %s698_s8, %s309_s26  ;;  %s343_s28 = sshll.u32 %s213_s27, 4  ;;  %s893_s28 = int_to_ptr.vmem [resolvable:$true] %s343_s28 }
 0x12e   : > { %s312_s5 = smul.f32 %s310_s6, %s307_s4  ;;  %s311_s30 = sadd.f32 1e-08, %s304_s21 }
 0x12f   : > { %s891_s4 = scalar_lea.hbm %s942_s2, %s459_s20  ;;  %s330_s6 = scalar_lea.sflag [#allocation9], %s869_s15 }
 0x130   : > { %v313_v40 = vstv %s312_s5  ;;  %s608_s3 = scalar_lea.vmem %s893_s28, 128  ;;  %s699_s12 = smov [#allocation12]  }
 0x131   : > { %544 = vrsqrt.f32 %v313_v40  ;;  %vm316_vm0 = vcmp.eq.f32.partialorder %v313_v40, inf  ;;  %v319_v43 = vand.u32 2147483648, %v313_v40  ;;  %vm318_vm1 = vcmp.eq.f32.partialorder %v313_v40, 0.0  ;;  %p609_p0 = scmp.ne.s32.totalorder %s893_s28, %s608_s3  ;;  %s612_s18 = sshll.u32 %s699_s12, 4  ;;  %s613_s18 = int_to_ptr.vmem [resolvable:$false] %s612_s18 }
 0x132   : > { %s614_s5 = scalar_lea.vmem %s613_s18, 256  ;;  %p615_p10 = scmp.lt.s32.totalorder %s893_s28, %s613_s18 }
 0x133   : > { %p610_p7 = pnand %p609_p0, %p955_p5  ;;  %p616_p12 = scmp.lt.s32.totalorder %s614_s5, %s608_s3 }
 0x135   : > { %p611_p4 = pneg %p610_p7  ;;  %p617_p1 = por %p616_p12, %p615_p10 }
 0x137   : > { %p618_p2 = pnand %p617_p1, %p611_p4 }
 0x13b   : > { %v545_v41 = vpop.eup %544 }
 0x13c   : > { %v315_v42 = vmul.f32 %v545_v41, %v313_v40 }
 0x13e   : > { %v317_v44 = vsel %vm316_vm0, %v313_v40, %v315_v42 }
 0x13f   : > { %v320_v45 = vsel %vm318_vm1, %v319_v43, %v317_v44 }
 0x140   : > { %472 = vpush %v320_v45 }
 0x171   : > { %s473_s16 = spop %472 }
 0x172   : > { %s322_s19 = sadd.f32 1e-08, %s473_s16 }
 0x174   : > { %v323_v46 = vstv %s322_s19 }
 0x175   : > { %546 = vrcp.f32 %v323_v46 }
 0x17f   : > { %v547_v47 = vpop.eup %546 }
 0x180   : > { %474 = vpush %v547_v47 }
 0x1b1   : > { %s475_s29 = spop %474 }
 0x1b2   : > { %s326_s25 = smul.f32 %s475_s29, %s311_s30 }
 0x1b4   : > { %v327_v48 = vstv %s326_s25 }
 0x1b5   : > { %328 = vst [vmem:[%s213_s27] sm:$0xff] %v327_v48 }
 0x1b6   : > { %621 = shalt.err (!%p618_p2)
}
 0x1b7   : > { %s622_s15 = scalar_lea.hbm %s891_s4, 128  ;;  %s626_s19 = scalar_lea.hbm %s942_s2, 256 }
 0x1b8   : > { %p623_p9 = scmp.ne.s32.totalorder %s891_s4, %s622_s15  ;;  %p627_p6 = scmp.lt.u32.totalorder %s891_s4, %s942_s2 }
 0x1b9   : > { %p628_p13 = scmp.lt.u32.totalorder %s626_s19, %s622_s15  ;;  %p630_p0 = scmp.lt.u32.totalorder %s622_s15, %s891_s4 }
 0x1ba   : > { %p624_p11 = pnand %p623_p9, %p955_p5 }
 0x1bb   : > { %p629_p8 = por %p628_p13, %p627_p6 }
 0x1bc   : > { %p625_p3 = pneg %p624_p11 }
 0x1bd   : > { %p631_p7 = por %p630_p0, %p629_p8 }
 0x1bf   : > { %p632_p4 = pnand %p631_p7, %p625_p3 }
 0x1c1   : > { %635 = shalt.err (!%p632_p4)
}
 0x1c2   : > { %480 = dma.vmem_to_hbm [thread:$0]  (%p955_p5), %s893_s28, 128, %s891_s4, %s330_s6  }
 0x1c3 PF: > { %s355_s20 = sand.u32 1, %s674_s9   ;;  %p956_p10 = scmp.ne.s32.totalorder %s948_s24, 0 }
 0x1c4   : > { %p957_p12 = scmp.ge.s32.totalorder %s694_s14, 2  ;;  %s356_s27 = scalar_lea.sflag [#allocation9], %s355_s20 }
 0x1c6   : > { %p490_p1 = pnand %p957_p12, %p956_p10 }
 0x1c8   : > { %669 = dma.done.wait (!%p490_p1), %s356_s27, 128  }
 0x1c9   : > { %671 = vsyncadd (!%p490_p1), %s356_s27, 4294967168  ;;  %s21_s14 = sadd.s32 1, %s694_s14   ;;  %s958_s9 = smov %s678_s10 }
 0x1ca   : > { %p18_p2 = scmp.ge.s32.totalorder %s21_s14, 4   ;;  %s959_s10 = smov %s682_s11 }
 0x1cb   : > { %s960_s11 = smov %s771_s23  ;;  %s961_s12 = smov %s690_s13 }
 0x1cc   : > { %s962_s13 = smov %s964_s17  ;;  %20 = sbr.rel (!%p18_p2) target bundleno = 8 (0x8), region = 94 }
 0x1d3   :  { %361 = vsyncpa [#allocation8], 1 }
 0x1d4   :  { %363 = vsyncpa [#allocation8 + $0x1], 1 }
 0x1d5   :  { %364 = vsyncpa [#allocation11], 1 }
 0x1d6   :  { %366 = vsyncpa [#allocation11 + $0x1], 1 }
 0x1d7   :  { %367 = vsyncpa [#allocation9], 1 }
 0x1d8   :  { %369 = vsyncpa [#allocation9 + $0x1], 1 }

</bundles_post_ra>
